<compile_context>
chip_gen: v7x
topology: tpu7x:2x2x1
jax: 0.10.0
libtpu: 0.0.40
codegen_flags: <defaults>
</compile_context>

<pallas_src>
import jax
import jax.numpy as jnp
from jax.experimental import pallas as pl
from jax.experimental.pallas import tpu as pltpu


def _param_forward_kernel(w_hbm_ref, o_hbm_ref):
    # Forward pass of Model: return self.weights.
    # Both refs live in HBM (memory_space=pl.ANY); a single blocking DMA
    # copies the 40-byte parameter straight into the output buffer.  No VMEM
    # staging, no (8,128) padding, no vector ops are emitted.
    pltpu.sync_copy(w_hbm_ref, o_hbm_ref)


def model_forward(weights: jax.Array) -> jax.Array:
    """Minimal Pallas equivalent of Model.forward(): returns the parameter."""
    nbytes = weights.size * weights.dtype.itemsize
    return pl.pallas_call(
        _param_forward_kernel,
        out_shape=jax.ShapeDtypeStruct(weights.shape, weights.dtype),
        in_specs=[pl.BlockSpec(memory_space=pl.ANY)],
        out_specs=pl.BlockSpec(memory_space=pl.ANY),
        # Advisory: zero compute, ~80 bytes touched (read + write).
        cost_estimate=pl.CostEstimate(
            flops=0, transcendentals=0, bytes_accessed=2 * nbytes
        ),
    )(weights)


def model_forward_reference(weights: jax.Array) -> jax.Array:
    # Preferred production hot path per the perf review: a pure parameter
    # read needs no kernel at all (XLA buffer forwarding is free).
    # TODO(synk): if a downstream consumer (scale/add/matmul) of the weights
    # exists, fuse it into _param_forward_kernel instead of a standalone copy.
    return weights


if __name__ == "__main__":
    # Deterministic parameter init matching nn.Parameter(torch.zeros((1, 10))).
    params_size = (1, 10)
    _ = jax.random.PRNGKey(0)  # protocol consistency; module init is zeros
    weights = jnp.zeros(params_size, dtype=jnp.float32)

    out = jax.block_until_ready(model_forward(weights))

    expected = jnp.zeros(params_size, dtype=jnp.float32)
    assert out.shape == params_size
    assert out.dtype == jnp.float32
    assert bool(jnp.all(out == expected))
    assert bool(jnp.all(out == model_forward_reference(weights)))

    print("KERNEL_OK")
</pallas_src>

<mosaic_0001>
module attributes {stable_mosaic.version = 11 : i64} {
  func.func @_param_forward_kernel(%arg0: memref<1x10xf32, #tpu.memory_space<any>>, %arg1: memref<1x10xf32, #tpu.memory_space<any>>) attributes {dimension_semantics = [], scalar_prefetch = 0 : i64, scratch_operands = 0 : i64, tpu.core_type = #tpu.core_type<tc>} {
    "tpu.region"() ({
      %0 = tpu.sem_alloc : memref<!tpu.dma_semaphore, #tpu.memory_space<semaphore_mem>>
      tpu.enqueue_dma source(%arg0 : memref<1x10xf32, #tpu.memory_space<any>>) target(%arg1 : memref<1x10xf32, #tpu.memory_space<any>>) target_semaphore(%0 : memref<!tpu.dma_semaphore, #tpu.memory_space<semaphore_mem>>)
      tpu.wait_dma2 semaphore(%0 : memref<!tpu.dma_semaphore, #tpu.memory_space<semaphore_mem>>) src(%arg0 : memref<1x10xf32, #tpu.memory_space<any>>) dst(%arg1 : memref<1x10xf32, #tpu.memory_space<any>>)
      tpu.yield
    }) : () -> ()
    return
  }
}

</mosaic_0001>

<bundles_post_ra>
// kernel: tpu_custom_call.1
= control target key start
LH: loop header
LB: loop body
LE: loop exit
PB: predicated region body
PF: predicated region fallthrough
CT: control target
= control target key end

     0   :  { %s27_s6 = smov [#allocation2]   ;;  %s28_s7 = smov [#allocation3]   ;;  %s46_s0 = inlined_call_operand.hbm [shape: f32[1,10], index: 0, kind: input, shape index: {}]   ;;  %s47_s1 = inlined_call_operand.hbm [shape: f32[1,10], index: 1, kind: output, shape index: {}]  }
   0x1   :  { %s29_s8 = smov 0  }
   0x2   :  { %18 = dma.general %s46_s0, 16, %s47_s1, %s27_s6, %s28_s7, [#allocation4], %s29_s8, 0  }
   0x3   :  { %25 = dma.done.wait [#allocation2], 16 }
   0x4   :  { %26 = vsyncadd [#allocation2], 4294967280 }

</bundles_post_ra>
